<compile_context>
chip_gen: v5e
topology: v5e:2x2
jax: 0.10.0
libtpu: 0.0.40
codegen_flags: <defaults>
</compile_context>

<pallas_src>
import jax
import jax.numpy as jnp
from jax.experimental import pallas as pl
from jax.experimental.pallas import tpu as pltpu

HEAD_LANES = 128  # lane-dense padded width of the fused class/state head


def dnn_kernel(x_ref,
               w1_ref, b1_ref,
               w2_ref, b2_ref,
               w3_ref, b3_ref,
               wh_ref, bh_ref,
               out_ref):
    # MXU matmuls in bf16, f32 accumulation; bias/ReLU in f32 on the VPU.
    x = x_ref[...]
    if x.dtype != jnp.bfloat16:
        x = x.astype(jnp.bfloat16)

    h1 = jnp.dot(x, w1_ref[...], preferred_element_type=jnp.float32) + b1_ref[...]
    h1 = jnp.maximum(h1, 0.0)
    # TODO(synk): dropout(p=0.2) is identity here (eval-mode semantics); a
    # train-mode version would use pltpu.prng_seed + pltpu.prng_random_bits.

    h2 = jnp.dot(h1.astype(jnp.bfloat16), w2_ref[...],
                 preferred_element_type=jnp.float32) + b2_ref[...]
    h2 = jnp.maximum(h2, 0.0)

    h3 = jnp.dot(h2.astype(jnp.bfloat16), w3_ref[...],
                 preferred_element_type=jnp.float32) + b3_ref[...]
    h3 = jnp.maximum(h3, 0.0)

    # Fused + lane-padded heads: one MXU push, one unmasked lane-dense bf16 store.
    logits = (jnp.dot(h3.astype(jnp.bfloat16), wh_ref[...],
                      preferred_element_type=jnp.float32) + bh_ref[...])
    out_ref[...] = logits.astype(out_ref.dtype)


def _resident_spec(arr, single_buffer):
    """Full-array block with constant index_map -> fetched once, kept in VMEM."""
    index_map = lambda i: (0,) * arr.ndim
    if single_buffer:
        # Block never changes across the grid: a single buffer is enough.
        return pl.BlockSpec(arr.shape, index_map, pipeline_mode=pl.Buffered(1))
    return pl.BlockSpec(arr.shape, index_map)


def _dnn_call(x, params, tb, single_buffer_weights):
    B, F = x.shape
    w1, b1 = params["w1"], params["b1"]
    w2, b2 = params["w2"], params["b2"]
    w3, b3 = params["w3"], params["b3"]
    wh, bh = params["wh"], params["bh"]
    hpad = wh.shape[1]

    grid = (pl.cdiv(B, tb),)

    flops = 2 * B * (F * 128 + 128 * 64 + 64 * 32 + 32 * hpad)
    bytes_accessed = (
        x.size * x.dtype.itemsize
        + sum(params[k].size * params[k].dtype.itemsize
              for k in ("w1", "b1", "w2", "b2", "w3", "b3", "wh", "bh"))
        + B * hpad * 2)  # bf16 output slab

    return pl.pallas_call(
        dnn_kernel,
        out_shape=jax.ShapeDtypeStruct((B, hpad), jnp.bfloat16),
        grid=grid,
        in_specs=[
            pl.BlockSpec((tb, F), lambda i: (i, 0)),   # x: batch-tiled
            _resident_spec(w1, single_buffer_weights),
            _resident_spec(b1, single_buffer_weights),
            _resident_spec(w2, single_buffer_weights),
            _resident_spec(b2, single_buffer_weights),
            _resident_spec(w3, single_buffer_weights),
            _resident_spec(b3, single_buffer_weights),
            _resident_spec(wh, single_buffer_weights),
            _resident_spec(bh, single_buffer_weights),
        ],
        out_specs=pl.BlockSpec((tb, hpad), lambda i: (i, 0)),
        compiler_params=pltpu.CompilerParams(
            dimension_semantics=("parallel",)),
        cost_estimate=pl.CostEstimate(flops=flops, transcendentals=0,
                                      bytes_accessed=bytes_accessed),
    )(x, w1, b1, w2, b2, w3, b3, wh, bh)


def dnn_forward(x, params, *, block_b=2048):
    """x: [B, F] float32 (or bfloat16). Returns (class_pred, state_pred) in f32."""
    B, F = x.shape
    num_classes = params["num_classes"]
    num_states = params["num_states"]
    head = num_classes + num_states

    # Batch tile: multiple of 8 (or the full batch when B <= 8).  When B >= 16
    # we cap the tile at B//2 (rounded to a multiple of 8) so the grid always
    # has >= 2 steps -> both v7x TensorCores get work (harmless on v5e/v6e).
    block_b = max(8, (block_b // 8) * 8)
    if B <= 8:
        tb = B
    else:
        tb = min(block_b, 8 * max(1, (B // 2) // 8))

    try:
        out = _dnn_call(x, params, tb, single_buffer_weights=True)
    except Exception:
        # Fallback for jax builds where pipeline_mode=pl.Buffered(1) on a
        # top-level BlockSpec is not supported: identical kernel, default
        # double-buffered resident weights (~30 KiB extra VMEM, no perf loss).
        out = _dnn_call(x, params, tb, single_buffer_weights=False)

    # Slice the padded slab ONCE, cast the small slice to f32, then split.
    logits = out[:, :head].astype(jnp.float32)
    return logits[:, :num_classes], logits[:, num_classes:head]


def init_linear(key, in_dim, out_dim):
    """Mimic PyTorch nn.Linear default init: U[-1/sqrt(in), 1/sqrt(in)]."""
    kw, kb = jax.random.split(key)
    bound = 1.0 / jnp.sqrt(jnp.float32(in_dim))
    w = jax.random.uniform(kw, (in_dim, out_dim), jnp.float32, -bound, bound)
    b = jax.random.uniform(kb, (1, out_dim), jnp.float32, -bound, bound)
    return w, b


def make_params(key, input_size, num_classes, num_states):
    k1, k2, k3, k4, k5 = jax.random.split(key, 5)
    w1, b1 = init_linear(k1, input_size, 128)
    w2, b2 = init_linear(k2, 128, 64)
    w3, b3 = init_linear(k3, 64, 32)
    wc, bc = init_linear(k4, 32, num_classes)
    ws, bs = init_linear(k5, 32, num_states)

    # Fuse the two heads and zero-pad to a lane-dense multiple of 128 lanes.
    head = num_classes + num_states
    hpad = pl.cdiv(head, HEAD_LANES) * HEAD_LANES
    wh = jnp.zeros((32, hpad), jnp.float32).at[:, :head].set(
        jnp.concatenate([wc, ws], axis=1))
    bh = jnp.zeros((1, hpad), jnp.float32).at[:, :head].set(
        jnp.concatenate([bc, bs], axis=1))

    bf16 = jnp.bfloat16
    return dict(
        # kernel params: bf16 weights (MXU operands), f32 biases
        w1=w1.astype(bf16), b1=b1,
        w2=w2.astype(bf16), b2=b2,
        w3=w3.astype(bf16), b3=b3,
        wh=wh.astype(bf16), bh=bh,
        # unfused copies kept only for the pure-JAX reference
        wc=wc, bc=bc, ws=ws, bs=bs,
        num_classes=num_classes, num_states=num_states)


def dnn_reference(x, p):
    """Pure-JAX reference using the same bf16-operand / f32-accumulate scheme."""
    def mm(a, w):
        return jnp.dot(a.astype(jnp.bfloat16), w.astype(jnp.bfloat16),
                       preferred_element_type=jnp.float32)
    h1 = jnp.maximum(mm(x, p["w1"]) + p["b1"], 0.0)
    h2 = jnp.maximum(mm(h1, p["w2"]) + p["b2"], 0.0)
    h3 = jnp.maximum(mm(h2, p["w3"]) + p["b3"], 0.0)
    return mm(h3, p["wc"]) + p["bc"], mm(h3, p["ws"]) + p["bs"]


if __name__ == "__main__":
    key = jax.random.PRNGKey(0)
    k_params, k_x, k_x2 = jax.random.split(key, 3)

    batch = 8
    input_size = 16     # dataset.num_features (synthetic)
    num_classes = 4
    num_states = 3

    params = make_params(k_params, input_size, num_classes, num_states)

    # --- test 1: small batch (single grid step) ---
    x = jax.random.normal(k_x, (batch, input_size), dtype=jnp.float32)
    class_pred, state_pred = dnn_forward(x, params)
    jax.block_until_ready((class_pred, state_pred))

    ref_c, ref_s = dnn_reference(x, params)
    assert class_pred.shape == (batch, num_classes)
    assert state_pred.shape == (batch, num_states)
    assert jnp.allclose(class_pred, ref_c, atol=3e-2, rtol=3e-2)
    assert jnp.allclose(state_pred, ref_s, atol=3e-2, rtol=3e-2)

    # --- test 2: batch not a multiple of the tile (exercises edge masking) ---
    batch2 = 20  # tb=8 -> grid=(3,), last tile partial
    x2 = jax.random.normal(k_x2, (batch2, input_size), dtype=jnp.float32)
    class_pred2, state_pred2 = dnn_forward(x2, params)
    jax.block_until_ready((class_pred2, state_pred2))

    ref_c2, ref_s2 = dnn_reference(x2, params)
    assert class_pred2.shape == (batch2, num_classes)
    assert state_pred2.shape == (batch2, num_states)
    assert jnp.allclose(class_pred2, ref_c2, atol=3e-2, rtol=3e-2)
    assert jnp.allclose(state_pred2, ref_s2, atol=3e-2, rtol=3e-2)

    print("KERNEL_OK")
</pallas_src>

<mosaic_0001>
module attributes {stable_mosaic.version = 11 : i64} {
  func.func @dnn_kernel(%arg0: i32, %arg1: memref<8x16xf32, #tpu.memory_space<vmem>>, %arg2: memref<16x128xbf16, #tpu.memory_space<vmem>>, %arg3: memref<1x128xf32, #tpu.memory_space<vmem>>, %arg4: memref<128x64xbf16, #tpu.memory_space<vmem>>, %arg5: memref<1x64xf32, #tpu.memory_space<vmem>>, %arg6: memref<64x32xbf16, #tpu.memory_space<vmem>>, %arg7: memref<1x32xf32, #tpu.memory_space<vmem>>, %arg8: memref<32x128xbf16, #tpu.memory_space<vmem>>, %arg9: memref<1x128xf32, #tpu.memory_space<vmem>>, %arg10: memref<8x128xbf16, #tpu.memory_space<vmem>>) attributes {dimension_semantics = [#tpu.dimension_semantics<parallel>], iteration_bounds = array<i64: 1>, scalar_prefetch = 0 : i64, scratch_operands = 0 : i64, tpu.core_type = #tpu.core_type<tc>, window_params = [{transform_indices = @transform_0, window_bounds = array<i64: 8, 16>}, {pipeline_mode = #tpu.pipeline_mode<synchronous>, transform_indices = @transform_1, window_bounds = array<i64: 16, 128>}, {pipeline_mode = #tpu.pipeline_mode<synchronous>, transform_indices = @transform_2, window_bounds = array<i64: 1, 128>}, {pipeline_mode = #tpu.pipeline_mode<synchronous>, transform_indices = @transform_3, window_bounds = array<i64: 128, 64>}, {pipeline_mode = #tpu.pipeline_mode<synchronous>, transform_indices = @transform_4, window_bounds = array<i64: 1, 64>}, {pipeline_mode = #tpu.pipeline_mode<synchronous>, transform_indices = @transform_5, window_bounds = array<i64: 64, 32>}, {pipeline_mode = #tpu.pipeline_mode<synchronous>, transform_indices = @transform_6, window_bounds = array<i64: 1, 32>}, {pipeline_mode = #tpu.pipeline_mode<synchronous>, transform_indices = @transform_7, window_bounds = array<i64: 32, 128>}, {pipeline_mode = #tpu.pipeline_mode<synchronous>, transform_indices = @transform_8, window_bounds = array<i64: 1, 128>}, {transform_indices = @transform_9, window_bounds = array<i64: 8, 128>}]} {
    %c0 = arith.constant 0 : index
    %c0_0 = arith.constant 0 : index
    %0 = vector.load %arg1[%c0, %c0_0] : memref<8x16xf32, #tpu.memory_space<vmem>>, vector<8x16xf32>
    %1 = arith.truncf %0 : vector<8x16xf32> to vector<8x16xbf16>
    %c0_1 = arith.constant 0 : index
    %c0_2 = arith.constant 0 : index
    %2 = vector.load %arg2[%c0_1, %c0_2] : memref<16x128xbf16, #tpu.memory_space<vmem>>, vector<16x128xbf16>
    %cst = arith.constant dense<0.000000e+00> : vector<8x128xf32>
    %3 = tpu.matmul %1, %2, %cst {dimension_numbers = #tpu.dot_dimension_numbers<[1], [0], [0], [1], [0, 0, 1, 1], [], []>} : vector<8x16xbf16>, vector<16x128xbf16>, vector<8x128xf32> -> vector<8x128xf32>
    %c0_3 = arith.constant 0 : index
    %c0_4 = arith.constant 0 : index
    %4 = vector.load %arg3[%c0_3, %c0_4] : memref<1x128xf32, #tpu.memory_space<vmem>>, vector<1x128xf32>
    %5 = vector.broadcast %4 : vector<1x128xf32> to vector<8x128xf32>
    %6 = arith.addf %3, %5 : vector<8x128xf32>
    %cst_5 = arith.constant 0.000000e+00 : f32
    %7 = vector.broadcast %cst_5 : f32 to vector<8x128xf32>
    %8 = arith.maximumf %6, %7 : vector<8x128xf32>
    %9 = arith.truncf %8 : vector<8x128xf32> to vector<8x128xbf16>
    %c0_6 = arith.constant 0 : index
    %c0_7 = arith.constant 0 : index
    %10 = vector.load %arg4[%c0_6, %c0_7] : memref<128x64xbf16, #tpu.memory_space<vmem>>, vector<128x64xbf16>
    %cst_8 = arith.constant dense<0.000000e+00> : vector<8x64xf32>
    %11 = tpu.matmul %9, %10, %cst_8 {dimension_numbers = #tpu.dot_dimension_numbers<[1], [0], [0], [1], [0, 0, 1, 1], [], []>} : vector<8x128xbf16>, vector<128x64xbf16>, vector<8x64xf32> -> vector<8x64xf32>
    %c0_9 = arith.constant 0 : index
    %c0_10 = arith.constant 0 : index
    %12 = vector.load %arg5[%c0_9, %c0_10] : memref<1x64xf32, #tpu.memory_space<vmem>>, vector<1x64xf32>
    %13 = vector.broadcast %12 : vector<1x64xf32> to vector<8x64xf32>
    %14 = arith.addf %11, %13 : vector<8x64xf32>
    %cst_11 = arith.constant 0.000000e+00 : f32
    %15 = vector.broadcast %cst_11 : f32 to vector<8x64xf32>
    %16 = arith.maximumf %14, %15 : vector<8x64xf32>
    %17 = arith.truncf %16 : vector<8x64xf32> to vector<8x64xbf16>
    %c0_12 = arith.constant 0 : index
    %c0_13 = arith.constant 0 : index
    %18 = vector.load %arg6[%c0_12, %c0_13] : memref<64x32xbf16, #tpu.memory_space<vmem>>, vector<64x32xbf16>
    %cst_14 = arith.constant dense<0.000000e+00> : vector<8x32xf32>
    %19 = tpu.matmul %17, %18, %cst_14 {dimension_numbers = #tpu.dot_dimension_numbers<[1], [0], [0], [1], [0, 0, 1, 1], [], []>} : vector<8x64xbf16>, vector<64x32xbf16>, vector<8x32xf32> -> vector<8x32xf32>
    %c0_15 = arith.constant 0 : index
    %c0_16 = arith.constant 0 : index
    %20 = vector.load %arg7[%c0_15, %c0_16] : memref<1x32xf32, #tpu.memory_space<vmem>>, vector<1x32xf32>
    %21 = vector.broadcast %20 : vector<1x32xf32> to vector<8x32xf32>
    %22 = arith.addf %19, %21 : vector<8x32xf32>
    %cst_17 = arith.constant 0.000000e+00 : f32
    %23 = vector.broadcast %cst_17 : f32 to vector<8x32xf32>
    %24 = arith.maximumf %22, %23 : vector<8x32xf32>
    %25 = arith.truncf %24 : vector<8x32xf32> to vector<8x32xbf16>
    %c0_18 = arith.constant 0 : index
    %c0_19 = arith.constant 0 : index
    %26 = vector.load %arg8[%c0_18, %c0_19] : memref<32x128xbf16, #tpu.memory_space<vmem>>, vector<32x128xbf16>
    %cst_20 = arith.constant dense<0.000000e+00> : vector<8x128xf32>
    %27 = tpu.matmul %25, %26, %cst_20 {dimension_numbers = #tpu.dot_dimension_numbers<[1], [0], [0], [1], [0, 0, 1, 1], [], []>} : vector<8x32xbf16>, vector<32x128xbf16>, vector<8x128xf32> -> vector<8x128xf32>
    %c0_21 = arith.constant 0 : index
    %c0_22 = arith.constant 0 : index
    %28 = vector.load %arg9[%c0_21, %c0_22] : memref<1x128xf32, #tpu.memory_space<vmem>>, vector<1x128xf32>
    %29 = vector.broadcast %28 : vector<1x128xf32> to vector<8x128xf32>
    %30 = arith.addf %27, %29 : vector<8x128xf32>
    %31 = arith.truncf %30 : vector<8x128xf32> to vector<8x128xbf16>
    %c0_23 = arith.constant 0 : index
    %c0_24 = arith.constant 0 : index
    %32 = vector.load %arg10[%c0_23, %c0_24] : memref<8x128xbf16, #tpu.memory_space<vmem>>, vector<8x128xbf16>
    tpu.vector_store %arg10[%c0_23, %c0_24], %31 {strides = array<i32>} : memref<8x128xbf16, #tpu.memory_space<vmem>>, vector<8x128xbf16>,
    return
  }
  func.func @transform_0(%arg0: i32) -> (i32, i32) {
    %c0_i32 = arith.constant 0 : i32
    %c0_i32_0 = arith.constant 0 : i32
    return %arg0, %c0_i32 : i32, i32
  }
  func.func @transform_1(%arg0: i32) -> (i32, i32) {
    %c0_i32 = arith.constant 0 : i32
    %c0_i32_0 = arith.constant 0 : i32
    %c0_i32_1 = arith.constant 0 : i32
    return %c0_i32, %c0_i32_0 : i32, i32
  }
  func.func @transform_2(%arg0: i32) -> (i32, i32) {
    %c0_i32 = arith.constant 0 : i32
    %c0_i32_0 = arith.constant 0 : i32
    %c0_i32_1 = arith.constant 0 : i32
    return %c0_i32, %c0_i32_0 : i32, i32
  }
  func.func @transform_3(%arg0: i32) -> (i32, i32) {
    %c0_i32 = arith.constant 0 : i32
    %c0_i32_0 = arith.constant 0 : i32
    %c0_i32_1 = arith.constant 0 : i32
    return %c0_i32, %c0_i32_0 : i32, i32
  }
  func.func @transform_4(%arg0: i32) -> (i32, i32) {
    %c0_i32 = arith.constant 0 : i32
    %c0_i32_0 = arith.constant 0 : i32
    %c0_i32_1 = arith.constant 0 : i32
    return %c0_i32, %c0_i32_0 : i32, i32
  }
  func.func @transform_5(%arg0: i32) -> (i32, i32) {
    %c0_i32 = arith.constant 0 : i32
    %c0_i32_0 = arith.constant 0 : i32
    %c0_i32_1 = arith.constant 0 : i32
    return %c0_i32, %c0_i32_0 : i32, i32
  }
  func.func @transform_6(%arg0: i32) -> (i32, i32) {
    %c0_i32 = arith.constant 0 : i32
    %c0_i32_0 = arith.constant 0 : i32
    %c0_i32_1 = arith.constant 0 : i32
    return %c0_i32, %c0_i32_0 : i32, i32
  }
  func.func @transform_7(%arg0: i32) -> (i32, i32) {
    %c0_i32 = arith.constant 0 : i32
    %c0_i32_0 = arith.constant 0 : i32
    %c0_i32_1 = arith.constant 0 : i32
    return %c0_i32, %c0_i32_0 : i32, i32
  }
  func.func @transform_8(%arg0: i32) -> (i32, i32) {
    %c0_i32 = arith.constant 0 : i32
    %c0_i32_0 = arith.constant 0 : i32
    %c0_i32_1 = arith.constant 0 : i32
    return %c0_i32, %c0_i32_0 : i32, i32
  }
  func.func @transform_9(%arg0: i32) -> (i32, i32) {
    %c0_i32 = arith.constant 0 : i32
    %c0_i32_0 = arith.constant 0 : i32
    return %arg0, %c0_i32 : i32, i32
  }
}

module attributes {stable_mosaic.version = 11 : i64} {
  func.func @dnn_kernel(%arg0: i32, %arg1: memref<8x16xf32, #tpu.memory_space<vmem>>, %arg2: memref<16x128xbf16, #tpu.memory_space<vmem>>, %arg3: memref<1x128xf32, #tpu.memory_space<vmem>>, %arg4: memref<128x64xbf16, #tpu.memory_space<vmem>>, %arg5: memref<1x64xf32, #tpu.memory_space<vmem>>, %arg6: memref<64x32xbf16, #tpu.memory_space<vmem>>, %arg7: memref<1x32xf32, #tpu.memory_space<vmem>>, %arg8: memref<32x128xbf16, #tpu.memory_space<vmem>>, %arg9: memref<1x128xf32, #tpu.memory_space<vmem>>, %arg10: memref<8x128xbf16, #tpu.memory_space<vmem>>) attributes {dimension_semantics = [#tpu.dimension_semantics<parallel>], iteration_bounds = array<i64: 1>, scalar_prefetch = 0 : i64, scratch_operands = 0 : i64, tpu.core_type = #tpu.core_type<tc>, window_params = [{transform_indices = @transform_0, window_bounds = array<i64: 8, 16>}, {pipeline_mode = #tpu.pipeline_mode<synchronous>, transform_indices = @transform_1, window_bounds = array<i64: 16, 128>}, {pipeline_mode = #tpu.pipeline_mode<synchronous>, transform_indices = @transform_2, window_bounds = array<i64: 1, 128>}, {pipeline_mode = #tpu.pipeline_mode<synchronous>, transform_indices = @transform_3, window_bounds = array<i64: 128, 64>}, {pipeline_mode = #tpu.pipeline_mode<synchronous>, transform_indices = @transform_4, window_bounds = array<i64: 1, 64>}, {pipeline_mode = #tpu.pipeline_mode<synchronous>, transform_indices = @transform_5, window_bounds = array<i64: 64, 32>}, {pipeline_mode = #tpu.pipeline_mode<synchronous>, transform_indices = @transform_6, window_bounds = array<i64: 1, 32>}, {pipeline_mode = #tpu.pipeline_mode<synchronous>, transform_indices = @transform_7, window_bounds = array<i64: 32, 128>}, {pipeline_mode = #tpu.pipeline_mode<synchronous>, transform_indices = @transform_8, window_bounds = array<i64: 1, 128>}, {transform_indices = @transform_9, window_bounds = array<i64: 8, 128>}]} {
    %c0 = arith.constant 0 : index
    %c0_0 = arith.constant 0 : index
    %0 = vector.load %arg1[%c0, %c0_0] : memref<8x16xf32, #tpu.memory_space<vmem>>, vector<8x16xf32>
    %1 = arith.truncf %0 : vector<8x16xf32> to vector<8x16xbf16>
    %c0_1 = arith.constant 0 : index
    %c0_2 = arith.constant 0 : index
    %2 = vector.load %arg2[%c0_1, %c0_2] : memref<16x128xbf16, #tpu.memory_space<vmem>>, vector<16x128xbf16>
    %cst = arith.constant dense<0.000000e+00> : vector<8x128xf32>
    %3 = tpu.matmul %1, %2, %cst {dimension_numbers = #tpu.dot_dimension_numbers<[1], [0], [0], [1], [0, 0, 1, 1], [], []>} : vector<8x16xbf16>, vector<16x128xbf16>, vector<8x128xf32> -> vector<8x128xf32>
    %c0_3 = arith.constant 0 : index
    %c0_4 = arith.constant 0 : index
    %4 = vector.load %arg3[%c0_3, %c0_4] : memref<1x128xf32, #tpu.memory_space<vmem>>, vector<1x128xf32>
    %5 = vector.broadcast %4 : vector<1x128xf32> to vector<8x128xf32>
    %6 = arith.addf %3, %5 : vector<8x128xf32>
    %cst_5 = arith.constant 0.000000e+00 : f32
    %7 = vector.broadcast %cst_5 : f32 to vector<8x128xf32>
    %8 = arith.maximumf %6, %7 : vector<8x128xf32>
    %9 = arith.truncf %8 : vector<8x128xf32> to vector<8x128xbf16>
    %c0_6 = arith.constant 0 : index
    %c0_7 = arith.constant 0 : index
    %10 = vector.load %arg4[%c0_6, %c0_7] : memref<128x64xbf16, #tpu.memory_space<vmem>>, vector<128x64xbf16>
    %cst_8 = arith.constant dense<0.000000e+00> : vector<8x64xf32>
    %11 = tpu.matmul %9, %10, %cst_8 {dimension_numbers = #tpu.dot_dimension_numbers<[1], [0], [0], [1], [0, 0, 1, 1], [], []>} : vector<8x128xbf16>, vector<128x64xbf16>, vector<8x64xf32> -> vector<8x64xf32>
    %c0_9 = arith.constant 0 : index
    %c0_10 = arith.constant 0 : index
    %12 = vector.load %arg5[%c0_9, %c0_10] : memref<1x64xf32, #tpu.memory_space<vmem>>, vector<1x64xf32>
    %13 = vector.broadcast %12 : vector<1x64xf32> to vector<8x64xf32>
    %14 = arith.addf %11, %13 : vector<8x64xf32>
    %cst_11 = arith.constant 0.000000e+00 : f32
    %15 = vector.broadcast %cst_11 : f32 to vector<8x64xf32>
    %16 = arith.maximumf %14, %15 : vector<8x64xf32>
    %17 = arith.truncf %16 : vector<8x64xf32> to vector<8x64xbf16>
    %c0_12 = arith.constant 0 : index
    %c0_13 = arith.constant 0 : index
    %18 = vector.load %arg6[%c0_12, %c0_13] : memref<64x32xbf16, #tpu.memory_space<vmem>>, vector<64x32xbf16>
    %cst_14 = arith.constant dense<0.000000e+00> : vector<8x32xf32>
    %19 = tpu.matmul %17, %18, %cst_14 {dimension_numbers = #tpu.dot_dimension_numbers<[1], [0], [0], [1], [0, 0, 1, 1], [], []>} : vector<8x64xbf16>, vector<64x32xbf16>, vector<8x32xf32> -> vector<8x32xf32>
    %c0_15 = arith.constant 0 : index
    %c0_16 = arith.constant 0 : index
    %20 = vector.load %arg7[%c0_15, %c0_16] : memref<1x32xf32, #tpu.memory_space<vmem>>, vector<1x32xf32>
    %21 = vector.broadcast %20 : vector<1x32xf32> to vector<8x32xf32>
    %22 = arith.addf %19, %21 : vector<8x32xf32>
    %cst_17 = arith.constant 0.000000e+00 : f32
    %23 = vector.broadcast %cst_17 : f32 to vector<8x32xf32>
    %24 = arith.maximumf %22, %23 : vector<8x32xf32>
    %25 = arith.truncf %24 : vector<8x32xf32> to vector<8x32xbf16>
    %c0_18 = arith.constant 0 : index
    %c0_19 = arith.constant 0 : index
    %26 = vector.load %arg8[%c0_18, %c0_19] : memref<32x128xbf16, #tpu.memory_space<vmem>>, vector<32x128xbf16>
    %cst_20 = arith.constant dense<0.000000e+00> : vector<8x128xf32>
    %27 = tpu.matmul %25, %26, %cst_20 {dimension_numbers = #tpu.dot_dimension_numbers<[1], [0], [0], [1], [0, 0, 1, 1], [], []>} : vector<8x32xbf16>, vector<32x128xbf16>, vector<8x128xf32> -> vector<8x128xf32>
    %c0_21 = arith.constant 0 : index
    %c0_22 = arith.constant 0 : index
    %28 = vector.load %arg9[%c0_21, %c0_22] : memref<1x128xf32, #tpu.memory_space<vmem>>, vector<1x128xf32>
    %29 = vector.broadcast %28 : vector<1x128xf32> to vector<8x128xf32>
    %30 = arith.addf %27, %29 : vector<8x128xf32>
    %31 = arith.truncf %30 : vector<8x128xf32> to vector<8x128xbf16>
    %c0_23 = arith.constant 0 : index
    %c0_24 = arith.constant 0 : index
    %32 = vector.load %arg10[%c0_23, %c0_24] : memref<8x128xbf16, #tpu.memory_space<vmem>>, vector<8x128xbf16>
    tpu.vector_store %arg10[%c0_23, %c0_24], %31 {strides = array<i32>} : memref<8x128xbf16, #tpu.memory_space<vmem>>, vector<8x128xbf16>,
    return
  }
  func.func @transform_0(%arg0: i32) -> (i32, i32) {
    %c0_i32 = arith.constant 0 : i32
    %c0_i32_0 = arith.constant 0 : i32
    return %arg0, %c0_i32 : i32, i32
  }
  func.func @transform_1(%arg0: i32) -> (i32, i32) {
    %c0_i32 = arith.constant 0 : i32
    %c0_i32_0 = arith.constant 0 : i32
    %c0_i32_1 = arith.constant 0 : i32
    return %c0_i32, %c0_i32_0 : i32, i32
  }
  func.func @transform_2(%arg0: i32) -> (i32, i32) {
    %c0_i32 = arith.constant 0 : i32
    %c0_i32_0 = arith.constant 0 : i32
    %c0_i32_1 = arith.constant 0 : i32
    return %c0_i32, %c0_i32_0 : i32, i32
  }
  func.func @transform_3(%arg0: i32) -> (i32, i32) {
    %c0_i32 = arith.constant 0 : i32
    %c0_i32_0 = arith.constant 0 : i32
    %c0_i32_1 = arith.constant 0 : i32
    return %c0_i32, %c0_i32_0 : i32, i32
  }
  func.func @transform_4(%arg0: i32) -> (i32, i32) {
    %c0_i32 = arith.constant 0 : i32
    %c0_i32_0 = arith.constant 0 : i32
    %c0_i32_1 = arith.constant 0 : i32
    return %c0_i32, %c0_i32_0 : i32, i32
  }
  func.func @transform_5(%arg0: i32) -> (i32, i32) {
    %c0_i32 = arith.constant 0 : i32
    %c0_i32_0 = arith.constant 0 : i32
    %c0_i32_1 = arith.constant 0 : i32
    return %c0_i32, %c0_i32_0 : i32, i32
  }
  func.func @transform_6(%arg0: i32) -> (i32, i32) {
    %c0_i32 = arith.constant 0 : i32
    %c0_i32_0 = arith.constant 0 : i32
    %c0_i32_1 = arith.constant 0 : i32
    return %c0_i32, %c0_i32_0 : i32, i32
  }
  func.func @transform_7(%arg0: i32) -> (i32, i32) {
    %c0_i32 = arith.constant 0 : i32
    %c0_i32_0 = arith.constant 0 : i32
    %c0_i32_1 = arith.constant 0 : i32
    return %c0_i32, %c0_i32_0 : i32, i32
  }
  func.func @transform_8(%arg0: i32) -> (i32, i32) {
    %c0_i32 = arith.constant 0 : i32
    %c0_i32_0 = arith.constant 0 : i32
    %c0_i32_1 = arith.constant 0 : i32
    return %c0_i32, %c0_i32_0 : i32, i32
  }
  func.func @transform_9(%arg0: i32) -> (i32, i32) {
    %c0_i32 = arith.constant 0 : i32
    %c0_i32_0 = arith.constant 0 : i32
    return %arg0, %c0_i32 : i32, i32
  }
}

</mosaic_0001>

<bundles_post_ra>
// kernel: tpu_custom_call.1
= control target key start
LH: loop header
LB: loop body
LE: loop exit
PB: predicated region body
PF: predicated region fallthrough
CT: control target
= control target key end

     0   :  { %vm48_vm0 = vcmask 130048   ;;  %s483_s0 = inlined_call_operand.vmem [shape: f32[8,16], index: 0, kind: input, shape index: {}]   ;;  %s484_s1 = inlined_call_operand.vmem [shape: bf16[16,128], index: 1, kind: input, shape index: {}]   ;;  %s485_s2 = inlined_call_operand.vmem [shape: f32[1,128], index: 2, kind: input, shape index: {}]   ;;  %s486_s3 = inlined_call_operand.vmem [shape: bf16[128,64], index: 3, kind: input, shape index: {}]   ;;  %s487_s4 = inlined_call_operand.vmem [shape: f32[1,64], index: 4, kind: input, shape index: {}]   ;;  %s488_s5 = inlined_call_operand.vmem [shape: bf16[64,32], index: 5, kind: input, shape index: {}]   ;;  %s489_s6 = inlined_call_operand.vmem [shape: f32[1,32], index: 6, kind: input, shape index: {}]   ;;  %s490_s7 = inlined_call_operand.vmem [shape: bf16[32,128], index: 7, kind: input, shape index: {}]   ;;  %s491_s8 = inlined_call_operand.vmem [shape: f32[1,128], index: 8, kind: input, shape index: {}]   ;;  %s492_s9 = inlined_call_operand.hbm [shape: bf16[8,128], index: 9, kind: output, shape index: {}]  }
   0x1   :  { %v323_v0 = vld [vmem:[%s484_s1] sm:$0xff]  ;;  %v331_v2 = vld [vmem:[%s486_s3 + $0x38] sm:$0xff]  ;;  %v330_v4 = vld [vmem:[%s486_s3 + $0x30] sm:$0xff] }
   0x2   :  { %v34_v1 = vld [vmem:[%s483_s0] sm:$0xff]  ;;  %59 = vmatpush.bf16.msra.mxu0 %v323_v0  ;;  %135 = vmatpush.bf16.msra.mxu1 %v331_v2 }
   0x3   :  { %v35_v3 = vpack.c.bf16 %v34_v1, %v34_v1 }
   0x4   :  { %14 = vsyncpa [#allocation3], 0  ;;  %v329_v5 = vld [vmem:[%s486_s3 + $0x28] sm:$0xff]  ;;  %v328_v6 = vld [vmem:[%s486_s3 + $0x20] sm:$0xff]  ;;  %vm186_vm1 = vcmask 523264   ;;  %vm225_vm2 = vcmask 261120  }
   0x5   :  { %264 = vmatmul.msk.bf16.vlgmr.msra.gmra.mxu0 %vm48_vm0, %v35_v3  ;;  %v327_v7 = vld [vmem:[%s486_s3 + $0x18] sm:$0xff]  ;;  %v326_v8 = vld [vmem:[%s486_s3 + $0x10] sm:$0xff]  ;;  %v325_v9 = vld [vmem:[%s486_s3 + $0x8] sm:$0xff]  ;;  %s369_s20 = smov [#allocation2]   ;;  %s251_s23 = sshll.u32 %s492_s9, 4  ;;  %s252_s23 = int_to_ptr.hbm [resolvable:$true] %s251_s23 }
   0x6   :  { %136 = vmatpush.bf16.msra.mxu1 %v330_v4  ;;  %v324_v10 = vld [vmem:[%s486_s3] sm:$0xff]  ;;  %v335_v11 = vld [vmem:[%s488_s5 + $0x18] sm:$0xff]  ;;  %v334_v12 = vld [vmem:[%s488_s5 + $0x10] sm:$0xff]  ;;  %s249_s21 = sshll.u32 %s369_s20, 4  ;;  %s250_s21 = int_to_ptr.vmem [resolvable:$true] %s249_s21 }
   0x7   :  { %194 = vmatpush.bf16.msra.mxu2 %v335_v11  ;;  %v339_v13 = vld [vmem:[%s485_s2] ss:$0 sm:$0xff]  ;;  %v333_v19 = vld [vmem:[%s488_s5 + $0x8] sm:$0xff] }
   0x8   :  { %v332_v20 = vld [vmem:[%s488_s5] sm:$0xff]  ;;  %v337_v27 = vld [vmem:[%s490_s7 + $0x8] sm:$0xff] }
   0x9   :  { %v340_v21 = vld [vmem:[%s487_s4] ss:$0 sm:$0xff]  ;;  %235 = vmatpush.bf16.msra.mxu3 %v337_v27 }
   0xa   :  { %137 = vmatpush.bf16.msra.mxu1 %v329_v5  ;;  %v336_v28 = vld [vmem:[%s490_s7] sm:$0xff] }
   0xb   :  { %195 = vmatpush.bf16.msra.mxu2 %v334_v12  ;;  %v341_v29 = vld [vmem:[%s489_s6] ss:$0 sm:$0xff] }
   0xc   :  { %v342_v35 = vld [vmem:[%s491_s8] ss:$0 sm:$0xff] }
   0xd   :  { %236 = vmatpush.bf16.msra.mxu3 %v336_v28 }
   0xe   :  { %138 = vmatpush.bf16.msra.mxu1 %v328_v6 }
   0xf   :  { %196 = vmatpush.bf16.msra.mxu2 %v333_v19 }
  0x12   :  { %139 = vmatpush.bf16.msra.mxu1 %v327_v7 }
  0x13   :  { %197 = vmatpush.bf16.msra.mxu2 %v332_v20 }
  0x16   :  { %140 = vmatpush.bf16.msra.mxu1 %v326_v8 }
  0x1a   :  { %141 = vmatpush.bf16.msra.mxu1 %v325_v9 }
  0x1e   :  { %142 = vmatpush.bf16.msra.mxu1 %v324_v10 }
  0x82   :  { %v61_v14 = vpop.f32.mrf.mxu0 }
  0x83   :  { %v62_v15 = vadd.f32 %v339_v13, %v61_v14 }
  0x85   :  { %v65_v16 = vmax.f32 %v62_v15, 0.0 }
  0x87   :  { %v66_v17 = vpack.c.bf16 %v65_v16, %v65_v16 }
  0x89   :  { %143 = vmatmul.bf16.vlgmr.msra.gmra.mxu1 %v66_v17 }
  0x8a   :  { %v63_v18 = vpop.f32.mrf.mxu0 }
 0x106   :  { %v144_v22 = vpop.f32.mrf.mxu1 }
 0x107   :  { %v145_v23 = vadd.f32 %v340_v21, %v144_v22 }
 0x109   :  { %v148_v24 = vmax.f32 %v145_v23, 0.0 }
 0x10b   :  { %v149_v25 = vpack.c.bf16 %v148_v24, %v148_v24 }
 0x10d   :  { %313 = vmatmul.msk.bf16.vlgmr.msra.gmra.mxu2 %vm186_vm1, %v149_v25 }
 0x10e   :  { %v146_v26 = vpop.f32.mrf.mxu1 }
 0x190   :  { %v199_v30 = vpop.f32.mrf.mxu2 }
 0x191   :  { %v200_v31 = vadd.f32 %v341_v29, %v199_v30 }
 0x193   :  { %v203_v32 = vmax.f32 %v200_v31, 0.0 }
 0x195   :  { %v204_v33 = vpack.c.bf16 %v203_v32, %v203_v32 }
 0x197   :  { %322 = vmatmul.msk.bf16.vlgmr.msra.gmra.mxu3 %vm225_vm2, %v204_v33 }
 0x198   :  { %v201_v34 = vpop.f32.mrf.mxu2 }
 0x21a   :  { %v238_v36 = vpop.f32.mrf.mxu3 }
 0x21b   :  { %v239_v37 = vadd.f32 %v342_v35, %v238_v36 }
 0x21d   :  { %v242_v38 = vpack.c.bf16 %v239_v37, %v239_v37 }
 0x21f   :  { %243 = vst [vmem:[#allocation2] sm:$0xf] %v242_v38 }
 0x220   :  { %254 = dma.vmem_to_hbm [thread:$0]  %s250_s21, 64, %s252_s23, [#allocation3]  }
 0x222   :  { %v240_v39 = vpop.f32.mrf.mxu3 }
 0x223   :  { %367 = dma.done.wait [#allocation3], 64  }
 0x224   :  { %368 = vsyncadd [#allocation3], 4294967232 }
 0x225   :  { %259 = vsyncpa [#allocation3], 1 }

// kernel: tpu_custom_call.1
= control target key start
LH: loop header
LB: loop body
LE: loop exit
PB: predicated region body
PF: predicated region fallthrough
CT: control target
= control target key end

     0   :  { %vm48_vm0 = vcmask 130048   ;;  %s483_s0 = inlined_call_operand.vmem [shape: f32[8,16], index: 0, kind: input, shape index: {}]   ;;  %s484_s1 = inlined_call_operand.vmem [shape: bf16[16,128], index: 1, kind: input, shape index: {}]   ;;  %s485_s2 = inlined_call_operand.vmem [shape: f32[1,128], index: 2, kind: input, shape index: {}]   ;;  %s486_s3 = inlined_call_operand.vmem [shape: bf16[128,64], index: 3, kind: input, shape index: {}]   ;;  %s487_s4 = inlined_call_operand.vmem [shape: f32[1,64], index: 4, kind: input, shape index: {}]   ;;  %s488_s5 = inlined_call_operand.vmem [shape: bf16[64,32], index: 5, kind: input, shape index: {}]   ;;  %s489_s6 = inlined_call_operand.vmem [shape: f32[1,32], index: 6, kind: input, shape index: {}]   ;;  %s490_s7 = inlined_call_operand.vmem [shape: bf16[32,128], index: 7, kind: input, shape index: {}]   ;;  %s491_s8 = inlined_call_operand.vmem [shape: f32[1,128], index: 8, kind: input, shape index: {}]   ;;  %s492_s9 = inlined_call_operand.hbm [shape: bf16[8,128], index: 9, kind: output, shape index: {}]  }
   0x1   :  { %v323_v0 = vld [vmem:[%s484_s1] sm:$0xff]  ;;  %v331_v2 = vld [vmem:[%s486_s3 + $0x38] sm:$0xff]  ;;  %v330_v4 = vld [vmem:[%s486_s3 + $0x30] sm:$0xff] }
   0x2   :  { %v34_v1 = vld [vmem:[%s483_s0] sm:$0xff]  ;;  %59 = vmatpush.bf16.msra.mxu0 %v323_v0  ;;  %135 = vmatpush.bf16.msra.mxu1 %v331_v2 }
   0x3   :  { %v35_v3 = vpack.c.bf16 %v34_v1, %v34_v1 }
   0x4   :  { %14 = vsyncpa [#allocation3], 0  ;;  %v329_v5 = vld [vmem:[%s486_s3 + $0x28] sm:$0xff]  ;;  %v328_v6 = vld [vmem:[%s486_s3 + $0x20] sm:$0xff]  ;;  %vm186_vm1 = vcmask 523264   ;;  %vm225_vm2 = vcmask 261120  }
   0x5   :  { %264 = vmatmul.msk.bf16.vlgmr.msra.gmra.mxu0 %vm48_vm0, %v35_v3  ;;  %v327_v7 = vld [vmem:[%s486_s3 + $0x18] sm:$0xff]  ;;  %v326_v8 = vld [vmem:[%s486_s3 + $0x10] sm:$0xff]  ;;  %v325_v9 = vld [vmem:[%s486_s3 + $0x8] sm:$0xff]  ;;  %s369_s20 = smov [#allocation2]   ;;  %s251_s23 = sshll.u32 %s492_s9, 4  ;;  %s252_s23 = int_to_ptr.hbm [resolvable:$true] %s251_s23 }
   0x6   :  { %136 = vmatpush.bf16.msra.mxu1 %v330_v4  ;;  %v324_v10 = vld [vmem:[%s486_s3] sm:$0xff]  ;;  %v335_v11 = vld [vmem:[%s488_s5 + $0x18] sm:$0xff]  ;;  %v334_v12 = vld [vmem:[%s488_s5 + $0x10] sm:$0xff]  ;;  %s249_s21 = sshll.u32 %s369_s20, 4  ;;  %s250_s21 = int_to_ptr.vmem [resolvable:$true] %s249_s21 }
   0x7   :  { %194 = vmatpush.bf16.msra.mxu2 %v335_v11  ;;  %v339_v13 = vld [vmem:[%s485_s2] ss:$0 sm:$0xff]  ;;  %v333_v19 = vld [vmem:[%s488_s5 + $0x8] sm:$0xff] }
   0x8   :  { %v332_v20 = vld [vmem:[%s488_s5] sm:$0xff]  ;;  %v337_v27 = vld [vmem:[%s490_s7 + $0x8] sm:$0xff] }
   0x9   :  { %v340_v21 = vld [vmem:[%s487_s4] ss:$0 sm:$0xff]  ;;  %235 = vmatpush.bf16.msra.mxu3 %v337_v27 }
   0xa   :  { %137 = vmatpush.bf16.msra.mxu1 %v329_v5  ;;  %v336_v28 = vld [vmem:[%s490_s7] sm:$0xff] }
   0xb   :  { %195 = vmatpush.bf16.msra.mxu2 %v334_v12  ;;  %v341_v29 = vld [vmem:[%s489_s6] ss:$0 sm:$0xff] }
   0xc   :  { %v342_v35 = vld [vmem:[%s491_s8] ss:$0 sm:$0xff] }
   0xd   :  { %236 = vmatpush.bf16.msra.mxu3 %v336_v28 }
   0xe   :  { %138 = vmatpush.bf16.msra.mxu1 %v328_v6 }
   0xf   :  { %196 = vmatpush.bf16.msra.mxu2 %v333_v19 }
  0x12   :  { %139 = vmatpush.bf16.msra.mxu1 %v327_v7 }
  0x13   :  { %197 = vmatpush.bf16.msra.mxu2 %v332_v20 }
  0x16   :  { %140 = vmatpush.bf16.msra.mxu1 %v326_v8 }
  0x1a   :  { %141 = vmatpush.bf16.msra.mxu1 %v325_v9 }
  0x1e   :  { %142 = vmatpush.bf16.msra.mxu1 %v324_v10 }
  0x82   :  { %v61_v14 = vpop.f32.mrf.mxu0 }
  0x83   :  { %v62_v15 = vadd.f32 %v339_v13, %v61_v14 }
  0x85   :  { %v65_v16 = vmax.f32 %v62_v15, 0.0 }
  0x87   :  { %v66_v17 = vpack.c.bf16 %v65_v16, %v65_v16 }
  0x89   :  { %143 = vmatmul.bf16.vlgmr.msra.gmra.mxu1 %v66_v17 }
  0x8a   :  { %v63_v18 = vpop.f32.mrf.mxu0 }
 0x106   :  { %v144_v22 = vpop.f32.mrf.mxu1 }
 0x107   :  { %v145_v23 = vadd.f32 %v340_v21, %v144_v22 }
 0x109   :  { %v148_v24 = vmax.f32 %v145_v23, 0.0 }
 0x10b   :  { %v149_v25 = vpack.c.bf16 %v148_v24, %v148_v24 }
 0x10d   :  { %313 = vmatmul.msk.bf16.vlgmr.msra.gmra.mxu2 %vm186_vm1, %v149_v25 }
 0x10e   :  { %v146_v26 = vpop.f32.mrf.mxu1 }
 0x190   :  { %v199_v30 = vpop.f32.mrf.mxu2 }
 0x191   :  { %v200_v31 = vadd.f32 %v341_v29, %v199_v30 }
 0x193   :  { %v203_v32 = vmax.f32 %v200_v31, 0.0 }
 0x195   :  { %v204_v33 = vpack.c.bf16 %v203_v32, %v203_v32 }
 0x197   :  { %322 = vmatmul.msk.bf16.vlgmr.msra.gmra.mxu3 %vm225_vm2, %v204_v33 }
 0x198   :  { %v201_v34 = vpop.f32.mrf.mxu2 }
 0x21a   :  { %v238_v36 = vpop.f32.mrf.mxu3 }
 0x21b   :  { %v239_v37 = vadd.f32 %v342_v35, %v238_v36 }
 0x21d   :  { %v242_v38 = vpack.c.bf16 %v239_v37, %v239_v37 }
 0x21f   :  { %243 = vst [vmem:[#allocation2] sm:$0xf] %v242_v38 }
 0x220   :  { %254 = dma.vmem_to_hbm [thread:$0]  %s250_s21, 64, %s252_s23, [#allocation3]  }
 0x222   :  { %v240_v39 = vpop.f32.mrf.mxu3 }
 0x223   :  { %367 = dma.done.wait [#allocation3], 64  }
 0x224   :  { %368 = vsyncadd [#allocation3], 4294967232 }
 0x225   :  { %259 = vsyncpa [#allocation3], 1 }

</bundles_post_ra>
